<compile_context>
chip_gen: v7x
topology: tpu7x:2x2x1
jax: 0.10.0
libtpu: 0.0.40
codegen_flags: <defaults>
</compile_context>

<pallas_src>
import math

import jax
import jax.numpy as jnp
from jax.experimental import pallas as pl
from jax.experimental.pallas import tpu as pltpu


def se_feedback_kernel(x_ref, pT_ref, w1a_ref, w1b_ref, b1_ref,
                       w2t_ref, b2_ref, o_ref):
    # x_ref: (B, C, HW)  — C on sublanes, HW on lanes.
    x = x_ref[...]
    xf = x.astype(jnp.float32)

    # --- squeeze: per-(batch, channel) spatial mean (lane reduce) -> (B, C, 1)
    y = jnp.mean(xf, axis=-1, keepdims=True)

    # --- fc1: concat([pool, p]) @ W1 split into two VPU mul + reduce terms ---
    # pooled term: (B, C, 1) * (C, Hd) -> (B, C, Hd); sublane reduce over C.
    t_pool = jnp.sum(y * w1a_ref[...], axis=1, keepdims=True)        # (B, 1, Hd)
    # feedback term (shared across batch): (fb, 1) * (fb, Hd); reduce over fb.
    t_fb = jnp.sum(pT_ref[...].astype(jnp.float32) * w1b_ref[...],
                   axis=0, keepdims=True)                            # (1, Hd)
    h = jnp.maximum(t_pool + t_fb + b1_ref[...], 0.0)                # (B, 1, Hd)

    # --- fc2 + sigmoid: (B, 1, Hd) * (C, Hd) -> (B, C, Hd); lane reduce over Hd
    s = jnp.sum(h * w2t_ref[...], axis=-1, keepdims=True) + b2_ref[...]  # (B, C, 1)
    s = jax.nn.sigmoid(s)

    # --- excite: broadcast channel scale across the spatial lanes ---
    o_ref[...] = (xf * s).astype(o_ref.dtype)


def se_layer_feedback(x, p, w1, b1, w2, b2, feedback_size):
    """x: (B, C, H, W) NCHW; p: (1, feedback_size).
    w1: (C+feedback_size, Hd), b1: (Hd,), w2: (Hd, C), b2: (C,)."""
    B, C, H, W = x.shape
    HW = H * W
    Hd = w1.shape[1]

    x3 = x.reshape(B, C, HW)
    # Split fc1 weight so concat([avgpool, p]) becomes two reduce terms, and
    # pre-orient everything so the kernel never transposes:
    w1a = w1[:C, :]                         # (C, Hd)  acts on pooled features
    w1b = w1[C:, :]                         # (fb, Hd) acts on feedback vector
    pT = p.reshape(feedback_size, 1)        # (fb, 1)  column-oriented feedback
    b1r = b1.reshape(1, Hd)                 # (1, Hd)
    w2t = w2.T                              # (C, Hd)  so fc2 is a lane reduce
    b2c = b2.reshape(C, 1)                  # (C, 1)

    vmem = pl.BlockSpec(memory_space=pltpu.MemorySpace.VMEM)
    out3 = pl.pallas_call(
        se_feedback_kernel,
        out_shape=jax.ShapeDtypeStruct((B, C, HW), x.dtype),
        in_specs=[vmem] * 7,
        out_specs=vmem,
    )(x3, pT, w1a, w1b, b1r, w2t, b2c)
    return out3.reshape(B, C, H, W)


def reference_jax(x, p, w1, b1, w2, b2, feedback_size):
    B, C, H, W = x.shape
    y = jnp.mean(x, axis=(2, 3))                               # (B, C)
    pe = jnp.broadcast_to(p, (B, feedback_size))               # expand
    y = jnp.concatenate([y, pe], axis=1)                       # (B, C+fb)
    h = jnp.maximum(y @ w1 + b1, 0.0)
    s = jax.nn.sigmoid(h @ w2 + b2)                            # (B, C)
    return x * s[:, :, None, None]


if __name__ == "__main__":
    # Module config (small, consistent with SELayer_feedback defaults):
    channel = 32
    reduction = 16
    feedback_size = 51
    num_hidden = math.floor(channel / reduction)               # = 2

    B, C, H, W = 2, channel, 8, 8

    key = jax.random.PRNGKey(0)
    kx, kp, k1, k2, k3, k4 = jax.random.split(key, 6)

    x = jax.random.normal(kx, (B, C, H, W), dtype=jnp.float32)
    p = jax.random.normal(kp, (1, feedback_size), dtype=jnp.float32)

    # Deterministic synthetic Linear params (PyTorch-style uniform init bounds).
    fan1 = channel + feedback_size
    w1 = jax.random.uniform(k1, (fan1, num_hidden), jnp.float32,
                            -1.0 / math.sqrt(fan1), 1.0 / math.sqrt(fan1))
    b1 = jax.random.uniform(k2, (num_hidden,), jnp.float32,
                            -1.0 / math.sqrt(fan1), 1.0 / math.sqrt(fan1))
    w2 = jax.random.uniform(k3, (num_hidden, channel), jnp.float32,
                            -1.0 / math.sqrt(num_hidden), 1.0 / math.sqrt(num_hidden))
    b2 = jax.random.uniform(k4, (channel,), jnp.float32,
                            -1.0 / math.sqrt(num_hidden), 1.0 / math.sqrt(num_hidden))

    out = se_layer_feedback(x, p, w1, b1, w2, b2, feedback_size)
    out = jax.block_until_ready(out)

    ref = reference_jax(x, p, w1, b1, w2, b2, feedback_size)
    assert out.shape == (B, C, H, W)
    assert jnp.allclose(out, ref, atol=1e-5, rtol=1e-5), "mismatch vs reference"

    print("KERNEL_OK")
</pallas_src>

<mosaic_0001>
module attributes {stable_mosaic.version = 11 : i64} {
  func.func @se_feedback_kernel(%arg0: memref<2x32x64xf32, #tpu.memory_space<vmem>>, %arg1: memref<51x1xf32, #tpu.memory_space<vmem>>, %arg2: memref<32x2xf32, #tpu.memory_space<vmem>>, %arg3: memref<51x2xf32, #tpu.memory_space<vmem>>, %arg4: memref<1x2xf32, #tpu.memory_space<vmem>>, %arg5: memref<32x2xf32, #tpu.memory_space<vmem>>, %arg6: memref<32x1xf32, #tpu.memory_space<vmem>>, %arg7: memref<2x32x64xf32, #tpu.memory_space<vmem>>) attributes {dimension_semantics = [], scalar_prefetch = 0 : i64, scratch_operands = 0 : i64, tpu.core_type = #tpu.core_type<tc>} {
    %c0 = arith.constant 0 : index
    %c0_0 = arith.constant 0 : index
    %c0_1 = arith.constant 0 : index
    %0 = vector.load %arg0[%c0, %c0_0, %c0_1] : memref<2x32x64xf32, #tpu.memory_space<vmem>>, vector<2x32x64xf32>
    %cst = arith.constant dense<0.000000e+00> : vector<2x32xf32>
    %1 = vector.multi_reduction <add>, %0, %cst [2] : vector<2x32x64xf32> to vector<2x32xf32>
    %2 = vector.shape_cast %1 : vector<2x32xf32> to vector<2x32x1xf32>
    %cst_2 = arith.constant 6.400000e+01 : f32
    %3 = vector.broadcast %cst_2 : f32 to vector<2x32x1xf32>
    %4 = arith.divf %2, %3 : vector<2x32x1xf32>
    %c0_3 = arith.constant 0 : index
    %c0_4 = arith.constant 0 : index
    %5 = vector.load %arg2[%c0_3, %c0_4] : memref<32x2xf32, #tpu.memory_space<vmem>>, vector<32x2xf32>
    %6 = vector.shape_cast %5 : vector<32x2xf32> to vector<1x32x2xf32>
    %7 = vector.broadcast %4 : vector<2x32x1xf32> to vector<2x32x2xf32>
    %8 = vector.broadcast %6 : vector<1x32x2xf32> to vector<2x32x2xf32>
    %9 = arith.mulf %7, %8 : vector<2x32x2xf32>
    %cst_5 = arith.constant dense<0.000000e+00> : vector<2x2xf32>
    %10 = vector.multi_reduction <add>, %9, %cst_5 [1] : vector<2x32x2xf32> to vector<2x2xf32>
    %11 = vector.shape_cast %10 : vector<2x2xf32> to vector<2x1x2xf32>
    %c0_6 = arith.constant 0 : index
    %c0_7 = arith.constant 0 : index
    %12 = vector.load %arg1[%c0_6, %c0_7] : memref<51x1xf32, #tpu.memory_space<vmem>>, vector<51x1xf32>
    %c0_8 = arith.constant 0 : index
    %c0_9 = arith.constant 0 : index
    %13 = vector.load %arg3[%c0_8, %c0_9] : memref<51x2xf32, #tpu.memory_space<vmem>>, vector<51x2xf32>
    %14 = vector.broadcast %12 : vector<51x1xf32> to vector<51x2xf32>
    %15 = arith.mulf %14, %13 : vector<51x2xf32>
    %cst_10 = arith.constant dense<0.000000e+00> : vector<2xf32>
    %16 = vector.multi_reduction <add>, %15, %cst_10 [0] : vector<51x2xf32> to vector<2xf32>
    %17 = vector.shape_cast %16 : vector<2xf32> to vector<1x2xf32>
    %18 = vector.shape_cast %17 : vector<1x2xf32> to vector<1x1x2xf32>
    %19 = vector.broadcast %18 : vector<1x1x2xf32> to vector<2x1x2xf32>
    %20 = arith.addf %11, %19 : vector<2x1x2xf32>
    %c0_11 = arith.constant 0 : index
    %c0_12 = arith.constant 0 : index
    %21 = vector.load %arg4[%c0_11, %c0_12] : memref<1x2xf32, #tpu.memory_space<vmem>>, vector<1x2xf32>
    %22 = vector.shape_cast %21 : vector<1x2xf32> to vector<1x1x2xf32>
    %23 = vector.broadcast %22 : vector<1x1x2xf32> to vector<2x1x2xf32>
    %24 = arith.addf %20, %23 : vector<2x1x2xf32>
    %cst_13 = arith.constant 0.000000e+00 : f32
    %25 = vector.broadcast %cst_13 : f32 to vector<2x1x2xf32>
    %26 = arith.maximumf %24, %25 : vector<2x1x2xf32>
    %c0_14 = arith.constant 0 : index
    %c0_15 = arith.constant 0 : index
    %27 = vector.load %arg5[%c0_14, %c0_15] : memref<32x2xf32, #tpu.memory_space<vmem>>, vector<32x2xf32>
    %28 = vector.shape_cast %27 : vector<32x2xf32> to vector<1x32x2xf32>
    %29 = vector.broadcast %26 : vector<2x1x2xf32> to vector<2x32x2xf32>
    %30 = vector.broadcast %28 : vector<1x32x2xf32> to vector<2x32x2xf32>
    %31 = arith.mulf %29, %30 : vector<2x32x2xf32>
    %cst_16 = arith.constant dense<0.000000e+00> : vector<2x32xf32>
    %32 = vector.multi_reduction <add>, %31, %cst_16 [2] : vector<2x32x2xf32> to vector<2x32xf32>
    %33 = vector.shape_cast %32 : vector<2x32xf32> to vector<2x32x1xf32>
    %c0_17 = arith.constant 0 : index
    %c0_18 = arith.constant 0 : index
    %34 = vector.load %arg6[%c0_17, %c0_18] : memref<32x1xf32, #tpu.memory_space<vmem>>, vector<32x1xf32>
    %35 = vector.shape_cast %34 : vector<32x1xf32> to vector<1x32x1xf32>
    %36 = vector.broadcast %35 : vector<1x32x1xf32> to vector<2x32x1xf32>
    %37 = arith.addf %33, %36 : vector<2x32x1xf32>
    %38 = arith.negf %37 : vector<2x32x1xf32>
    %39 = math.exp %38 : vector<2x32x1xf32>
    %cst_19 = arith.constant 1.000000e+00 : f32
    %40 = vector.broadcast %cst_19 : f32 to vector<2x32x1xf32>
    %41 = arith.addf %40, %39 : vector<2x32x1xf32>
    %42 = arith.divf %40, %41 : vector<2x32x1xf32>
    %43 = vector.broadcast %42 : vector<2x32x1xf32> to vector<2x32x64xf32>
    %44 = arith.mulf %0, %43 : vector<2x32x64xf32>
    %c0_20 = arith.constant 0 : index
    %c0_21 = arith.constant 0 : index
    %c0_22 = arith.constant 0 : index
    %45 = vector.load %arg7[%c0_20, %c0_21, %c0_22] : memref<2x32x64xf32, #tpu.memory_space<vmem>>, vector<2x32x64xf32>
    tpu.vector_store %arg7[%c0_20, %c0_21, %c0_22], %44 {strides = array<i32>} : memref<2x32x64xf32, #tpu.memory_space<vmem>>, vector<2x32x64xf32>,
    return
  }
}

</mosaic_0001>

<bundles_post_ra>
// kernel: tpu_custom_call.1
= control target key start
LH: loop header
LB: loop body
LE: loop exit
PB: predicated region body
PF: predicated region fallthrough
CT: control target
= control target key end

     0   :  { %vm35_vm0 = vcmask 523264   ;;  %v437_v6 = vmov 0   ;;  %s668_s0 = inlined_call_operand.vmem [shape: f32[2,32,64], index: 0, kind: input, shape index: {}]   ;;  %s669_s1 = inlined_call_operand.vmem [shape: f32[51,1], index: 1, kind: input, shape index: {}]   ;;  %s670_s2 = inlined_call_operand.vmem [shape: f32[32,2], index: 2, kind: input, shape index: {}]   ;;  %s671_s3 = inlined_call_operand.vmem [shape: f32[51,2], index: 3, kind: input, shape index: {}]   ;;  %s672_s4 = inlined_call_operand.vmem [shape: f32[1,2], index: 4, kind: input, shape index: {}]   ;;  %s673_s5 = inlined_call_operand.vmem [shape: f32[32,2], index: 5, kind: input, shape index: {}]   ;;  %s674_s6 = inlined_call_operand.vmem [shape: f32[32,1], index: 6, kind: input, shape index: {}]   ;;  %s675_s7 = inlined_call_operand.hbm [shape: f32[2,32,64], index: 7, kind: output, shape index: {}]  }
   0x1   :  { %v484_v0 = vld [vmem:[%s668_s0 + $0x20] sm:$0xff]  ;;  %v494_v2 = vld [vmem:[%s668_s0 + $0x28] sm:$0xff]  ;;  %380 = vset.pattern.permute.xlu1 %v437_v6  ;;  %379 = vset.pattern.permute.xlu0 %v437_v6  ;;  %v512_v9 = vld [vmem:[%s668_s0 + $0x30] sm:$0xff] }
   0x2   :  { %v489_v1 = vld [vmem:[%s668_s0] sm:$0xff]  ;;  %v48_v3 = vsel %vm35_vm0, %v484_v0, 0.0  ;;  %v503_v5 = vld [vmem:[%s668_s0 + $0x8] sm:$0xff]  ;;  %v51_v7 = vsel %vm35_vm0, %v494_v2, 0.0  ;;  %v517_v10 = vld [vmem:[%s668_s0 + $0x10] sm:$0xff] }
   0x3   :  { %v36_v4 = vsel %vm35_vm0, %v489_v1, 0.0  ;;  %49 = vadd.xlane.f32.xlu1 %v48_v3  ;;  %v39_v8 = vsel %vm35_vm0, %v503_v5, 0.0 }
   0x4   :  { %37 = vadd.xlane.f32.xlu0 %v36_v4 }
   0x5   :  { %12 = vsyncpa [#allocation3], 0  ;;  %v54_v11 = vsel %vm35_vm0, %v512_v9, 0.0  ;;  %v42_v12 = vsel %vm35_vm0, %v517_v10, 0.0  ;;  %v526_v13 = vld [vmem:[%s668_s0 + $0x18] sm:$0xff]  ;;  %v109_v15 = vld [vmem:[%s669_s1 + $0x8] sm:$0xff] }
   0x6   :  { %v45_v14 = vsel %vm35_vm0, %v526_v13, 0.0  ;;  %v108_v16 = vld [vmem:[%s669_s1] sm:$0xff]  ;;  %v110_v17 = vld [vmem:[%s669_s1 + $0x10] sm:$0xff]  ;;  %v111_v18 = vld [vmem:[%s669_s1 + $0x18] sm:$0xff]  ;;  %vm81_vm1 = vcmask 15360   ;;  %vm175_vm2 = vcmask 10240  }
   0x7   :  { %52 = vadd.xlane.f32.xlu1 %v51_v7  ;;  %v112_v19 = vld [vmem:[%s669_s1 + $0x20] sm:$0xff]  ;;  %v114_v20 = vld [vmem:[%s669_s1 + $0x30] sm:$0x7]  ;;  %v551_v21 = vld [vmem:[%s668_s0 + $0x38] sm:$0xff] }
   0x8   :  { %40 = vadd.xlane.f32.xlu0 %v39_v8  ;;  %v57_v22 = vsel %vm35_vm0, %v551_v21, 0.0  ;;  %v113_v23 = vld [vmem:[%s669_s1 + $0x28] sm:$0xff]  ;;  %v69_v37 = vld [vmem:[%s670_s2] sm:$0xff]  ;;  %v71_v40 = vld [vmem:[%s670_s2 + $0x10] sm:$0xff] }
   0x9   :  { %v70_v35 = vld [vmem:[%s670_s2 + $0x8] sm:$0xff]  ;;  %v72_v46 = vld [vmem:[%s670_s2 + $0x18] sm:$0xff]  ;;  %v115_v50 = vld [vmem:[%s671_s3] sm:$0xff] }
   0xa   :  { %v116_v49 = vld [vmem:[%s671_s3 + $0x8] sm:$0xff]  ;;  %v117_v58 = vld [vmem:[%s671_s3 + $0x10] sm:$0xff]  ;;  %v118_v3 = vld [vmem:[%s671_s3 + $0x18] sm:$0xff] }
   0xb   :  { %55 = vadd.xlane.f32.xlu1 %v54_v11 }
   0xc   :  { %43 = vadd.xlane.f32.xlu0 %v42_v12  ;;  %v119_v12 = vld [vmem:[%s671_s3 + $0x20] sm:$0xff] }
   0xf   :  { %46 = vadd.xlane.f32.xlu1 %v45_v14 }
  0x20   :  { %129 = vperm.xlu1 %380, %v109_v15  }
  0x22   :  { %124 = vperm.xlu0 %379, %v108_v16  }
  0x24   :  { %134 = vperm.xlu1 %380, %v110_v17  }
  0x28   :  { %139 = vperm.xlu1 %380, %v111_v18  }
  0x2c   :  { %144 = vperm.xlu1 %380, %v112_v19  }
  0x30   :  { %154 = vperm.xlu1 %380, %v114_v20  }
  0x41   :  { %58 = vadd.xlane.f32.xlu0 %v57_v22 }
  0x57   :  { %149 = vperm.xlu0 %379, %v113_v23  }
  0x90   :  { %v50_v24 = vpop.xlane.xlu1 %49 }
  0x91   :  { %v38_v27 = vpop.xlane.xlu0 %37  ;;  %v65_v33 = vmul.f32 0.015625, %v50_v24 }
  0x92   :  { %v61_v34 = vmul.f32 0.015625, %v38_v27 }
  0x93   :  { %v77_v43 = vmul.f32 %v69_v37, %v65_v33 }
  0x94   :  { %v53_v25 = vpop.xlane.xlu1 %52  ;;  %v73_v44 = vmul.f32 %v69_v37, %v61_v34  ;;  %v120_v34 = vld [vmem:[%s671_s3 + $0x28] sm:$0xff] }
  0x95   :  { %v41_v29 = vpop.xlane.xlu0 %40  ;;  %v66_v38 = vmul.f32 0.015625, %v53_v25  ;;  %v95_v55 = vsel %vm81_vm1, %v77_v43, 0.0 }
  0x96   :  { %v62_v32 = vmul.f32 0.015625, %v41_v29  ;;  %v82_v56 = vsel %vm81_vm1, %v73_v44, 0.0 }
  0x97   :  { %v78_v47 = vmul.f32 %v70_v35, %v66_v38 }
  0x98   :  { %v56_v26 = vpop.xlane.xlu1 %55  ;;  %v74_v41 = vmul.f32 %v70_v35, %v62_v32 }
  0x99   :  { %v44_v31 = vpop.xlane.xlu0 %43  ;;  %v67_v45 = vmul.f32 0.015625, %v56_v26  ;;  %v96_v59 = vsel %vm81_vm1, %v78_v47, 0.0 }
  0x9a   :  { %v63_v39 = vmul.f32 0.015625, %v44_v31  ;;  %v83_v53 = vsel %vm81_vm1, %v74_v41, 0.0  ;;  %v97_v7 = vadd.f32 %v96_v59, %v95_v55  ;;  %v121_v31 = vld [vmem:[%s671_s3 + $0x30] sm:$0x7] }
  0x9b   :  { %v79_v57 = vmul.f32 %v71_v40, %v67_v45  ;;  %v84_v63 = vadd.f32 %v83_v53, %v82_v56 }
  0x9c   :  { %v47_v28 = vpop.xlane.xlu1 %46  ;;  %v75_v48 = vmul.f32 %v71_v40, %v63_v39 }
  0x9d   :  { %v64_v42 = vmul.f32 0.015625, %v47_v28  ;;  %v98_v8 = vsel %vm81_vm1, %v79_v57, 0.0 }
  0x9e   :  { %v85_v60 = vsel %vm81_vm1, %v75_v48, 0.0  ;;  %v99_v25 = vadd.f32 %v98_v8, %v97_v7 }
  0x9f   :  { %v76_v54 = vmul.f32 %v72_v46, %v64_v42  ;;  %v86_v11 = vadd.f32 %v85_v60, %v84_v63 }
  0xa0   :  { %v130_v30 = vpop.permute.xlu1 %129 }
  0xa1   :  { %v125_v51 = vpop.permute.xlu0 %124  ;;  %v158_v61 = vmul.f32 %v130_v30, %v116_v49  ;;  %v87_v4 = vsel %vm81_vm1, %v76_v54, 0.0 }
  0xa2   :  { %v157_v62 = vmul.f32 %v125_v51, %v115_v50  ;;  %v88_v20 = vadd.f32 %v87_v4, %v86_v11 }
  0xa3   :  { %v165_v16 = vsel %vm81_vm1, %v158_v61, 0.0 }
  0xa4   :  { %v135_v36 = vpop.permute.xlu1 %134  ;;  %v164_v17 = vsel %vm81_vm1, %v157_v62, 0.0  ;;  %v89_v29 = vrot.slane %v88_v20, 4 }
  0xa5   :  { %v159_v6 = vmul.f32 %v135_v36, %v117_v58  ;;  %v166_v26 = vadd.f32 %v165_v16, %v164_v17  ;;  %v195_v58 = vlaneseq  ;;  %v191_v16 = vld [vmem:[%s673_s5] sm:$0xff] }
  0xa6   :  { %v90_v41 = vadd.f32 %v89_v29, %v88_v20 }
  0xa7   :  { %v167_v22 = vsel %vm81_vm1, %v159_v6, 0.0  ;;  %v196_v63 = vshrl.u32 %v195_v58, 7 }
  0xa8   :  { %v140_v52 = vpop.permute.xlu1 %139  ;;  %v168_v30 = vadd.f32 %v167_v22, %v166_v26  ;;  %v91_v47 = vrot.slane %v90_v41, 2 }
  0xa9   :  { %v160_v18 = vmul.f32 %v140_v52, %v118_v3  ;;  %v186_v3 = vld [vmem:[%s672_s4] sm:$0x1]  ;;  %v197_v8 = vsub.s32 0, %v196_v63 }
  0xaa   :  { %v92_v51 = vadd.f32 %v91_v47, %v90_v41 }
  0xab   :  { %v169_v27 = vsel %vm81_vm1, %v160_v18, 0.0 }
  0xac   :  { %v145_v14 = vpop.permute.xlu1 %144  ;;  %v170_v36 = vadd.f32 %v169_v27, %v168_v30  ;;  %v93_v55 = vrot.slane %v92_v51, 1  ;;  %v194_v27 = vld [vmem:[%s673_s5 + $0x18] sm:$0xff] }
  0xad   :  { %v161_v23 = vmul.f32 %v145_v14, %v119_v12 }
  0xae   :  { %v94_v60 = vadd.f32 %v93_v55, %v92_v51  ;;  %v238_v51 = vld [vmem:[%s674_s6 + $0x18] sm:$0xff] }
  0xaf   :  { %v171_v35 = vsel %vm81_vm1, %v161_v23, 0.0 }
  0xb0   :  { %v155_v32 = vpop.permute.xlu1 %154  ;;  %v172_v42 = vadd.f32 %v171_v35, %v170_v36 }
  0xb1   :  { %v163_v39 = vmul.f32 %v155_v32, %v121_v31 }
  0xce   :  { %v59_v15 = vpop.xlane.xlu0 %58 }
  0xcf   :  { %v68_v19 = vmul.f32 0.015625, %v59_v15  ;;  %v192_v15 = vld [vmem:[%s673_s5 + $0x8] sm:$0xff] }
  0xd1   :  { %v80_v24 = vmul.f32 %v72_v46, %v68_v19  ;;  %v176_v46 = vsel %vm175_vm2, %v163_v39, 0.0  ;;  %v193_v19 = vld [vmem:[%s673_s5 + $0x10] sm:$0xff]  ;;  %v235_v39 = vld [vmem:[%s674_s6] sm:$0xff] }
  0xd3   :  { %v100_v28 = vsel %vm81_vm1, %v80_v24, 0.0 }
  0xd4   :  { %v101_v33 = vadd.f32 %v100_v28, %v99_v25 }
  0xd6   :  { %v102_v37 = vrot.slane %v101_v33, 4  ;;  %v150_v38 = vpop.permute.xlu0 %149 }
  0xd7   :  { %v162_v40 = vmul.f32 %v150_v38, %v120_v34  ;;  %v236_v38 = vld [vmem:[%s674_s6 + $0x8] sm:$0xff] }
  0xd8   :  { %v103_v43 = vadd.f32 %v102_v37, %v101_v33 }
  0xd9   :  { %v173_v44 = vsel %vm81_vm1, %v162_v40, 0.0 }
  0xda   :  { %v174_v45 = vadd.f32 %v173_v44, %v172_v42  ;;  %v104_v48 = vrot.slane %v103_v43, 2  ;;  %v237_v44 = vld [vmem:[%s674_s6 + $0x10] sm:$0xff]  ;;  %s438_s6 = smov [#allocation2]  }
  0xdb   :  { %s356_s17 = sshll.u32 %s438_s6, 4  ;;  %s357_s17 = int_to_ptr.vmem [resolvable:$true] %s356_s17 }
  0xdc   :  { %v177_v49 = vadd.f32 %v176_v46, %v174_v45  ;;  %v105_v52 = vadd.f32 %v104_v48, %v103_v43  ;;  %s413_s2 = scalar_lea.vmem %s357_s17, 1024  ;;  %p418_p1 = scmp.lt.s32.totalorder %s357_s17, %s357_s17 }
  0xdd   :  { %p414_p0 = scmp.ne.s32.totalorder %s357_s17, %s413_s2  ;;  %p419_p2 = scmp.lt.s32.totalorder %s413_s2, %s413_s2 }
  0xde   :  { %v178_v50 = vrot.slane %v177_v49, 4  ;;  %v106_v56 = vrot.slane %v105_v52, 1 }
  0xdf   :  { %p420_p3 = por %p419_p2, %p418_p1 }
  0xe0   :  { %v179_v53 = vadd.f32 %v178_v50, %v177_v49  ;;  %v107_v61 = vadd.f32 %v106_v56, %v105_v52 }
  0xe1   :  { %p421_p4 = pnand %p420_p3, %p414_p0 }
  0xe2   :  { %v180_v54 = vrot.slane %v179_v53, 2 }
  0xe4   :  { %v181_v57 = vadd.f32 %v180_v54, %v179_v53 }
  0xe6   :  { %v182_v59 = vrot.slane %v181_v57, 1 }
  0xe8   :  { %v183_v62 = vadd.f32 %v182_v59, %v181_v57 }
  0xea   :  { %v184_v4 = vadd.f32 %v183_v62, %v94_v60  ;;  %v185_v6 = vadd.f32 %v183_v62, %v107_v61 }
  0xec   :  { %v187_v7 = vadd.f32 %v186_v3, %v184_v4  ;;  %v188_v11 = vadd.f32 %v186_v3, %v185_v6 }
  0xee   :  { %v189_v12 = vmax.f32 %v187_v7, 0.0  ;;  %v190_v14 = vmax.f32 %v188_v11, 0.0 }
  0xf0   :  { %v198_v17 = vrot.slane %v189_v12, %v197_v8  ;;  %v202_v18 = vrot.slane %v190_v14, %v197_v8 }
  0xf2   :  { %v204_v20 = vmul.f32 %v198_v17, %v192_v15  ;;  %v203_v22 = vmul.f32 %v198_v17, %v191_v16  ;;  %v208_v25 = vmul.f32 %v202_v18, %v192_v15  ;;  %v205_v26 = vmul.f32 %v198_v17, %v193_v19 }
  0xf3   :  { %v210_v30 = vmul.f32 %v202_v18, %v194_v27  ;;  %v206_v31 = vmul.f32 %v198_v17, %v194_v27  ;;  %v207_v34 = vmul.f32 %v202_v18, %v191_v16  ;;  %v209_v36 = vmul.f32 %v202_v18, %v193_v19 }
  0xf4   :  { %v214_v23 = vsel %vm81_vm1, %v204_v20, 0.0  ;;  %v211_v24 = vsel %vm81_vm1, %v203_v22, 0.0  ;;  %v226_v28 = vsel %vm81_vm1, %v208_v25, 0.0  ;;  %v217_v29 = vsel %vm81_vm1, %v205_v26, 0.0 }
  0xf5   :  { %215 = vadd.xlane.f32.xlu0 %v214_v23  ;;  %212 = vadd.xlane.f32.xlu1 %v211_v24  ;;  %v232_v32 = vsel %vm81_vm1, %v210_v30, 0.0  ;;  %v220_v33 = vsel %vm81_vm1, %v206_v31, 0.0  ;;  %v223_v35 = vsel %vm81_vm1, %v207_v34, 0.0  ;;  %v229_v37 = vsel %vm81_vm1, %v209_v36, 0.0 }
  0xf9   :  { %227 = vadd.xlane.f32.xlu0 %v226_v28  ;;  %218 = vadd.xlane.f32.xlu1 %v217_v29 }
  0xfd   :  { %233 = vadd.xlane.f32.xlu0 %v232_v32  ;;  %221 = vadd.xlane.f32.xlu1 %v220_v33 }
 0x101   :  { %224 = vadd.xlane.f32.xlu1 %v223_v35 }
 0x105   :  { %230 = vadd.xlane.f32.xlu1 %v229_v37 }
 0x182   :  { %v216_v40 = vpop.xlane.xlu0 %215  ;;  %v213_v41 = vpop.xlane.xlu1 %212 }
 0x183   :  { %v240_v42 = vadd.f32 %v236_v38, %v216_v40  ;;  %v239_v43 = vadd.f32 %v235_v39, %v213_v41 }
 0x185   :  { %v368_v45 = vmul.f32 -1.442695, %v240_v42  ;;  %v367_v46 = vmul.f32 -1.442695, %v239_v43 }
 0x186   :  { %v228_v47 = vpop.xlane.xlu0 %227  ;;  %v219_v48 = vpop.xlane.xlu1 %218 }
 0x187   :  { %381 = vpow2.f32 %v368_v45  ;;  %v244_v49 = vadd.f32 %v236_v38, %v228_v47  ;;  %v241_v50 = vadd.f32 %v237_v44, %v219_v48 }
 0x188   :  { %383 = vpow2.f32 %v367_v46 }
 0x189   :  { %v369_v52 = vmul.f32 -1.442695, %v241_v50  ;;  %v372_v55 = vmul.f32 -1.442695, %v244_v49 }
 0x18a   :  { %v234_v53 = vpop.xlane.xlu0 %233  ;;  %v222_v54 = vpop.xlane.xlu1 %221 }
 0x18b   :  { %v246_v56 = vadd.f32 %v238_v51, %v234_v53  ;;  %v242_v57 = vadd.f32 %v238_v51, %v222_v54  ;;  %385 = vpow2.f32 %v369_v52 }
 0x18c   :  { %387 = vpow2.f32 %v372_v55 }
 0x18d   :  { %v370_v58 = vmul.f32 -1.442695, %v242_v57  ;;  %v374_v59 = vmul.f32 -1.442695, %v246_v56 }
 0x18e   :  { %v225_v60 = vpop.xlane.xlu1 %224 }
 0x18f   :  { %v243_v61 = vadd.f32 %v235_v39, %v225_v60  ;;  %389 = vpow2.f32 %v370_v58 }
 0x190   :  { %391 = vpow2.f32 %v374_v59 }
 0x191   :  { %v382_v62 = vpop.eup %381  ;;  %v371_v63 = vmul.f32 -1.442695, %v243_v61 }
 0x192   :  { %v384_v3 = vpop.eup %383  ;;  %v272_v4 = vadd.f32 1.0, %v382_v62  ;;  %v231_v6 = vpop.xlane.xlu1 %230 }
 0x193   :  { %v271_v7 = vadd.f32 1.0, %v384_v3  ;;  %393 = vpow2.f32 %v371_v63  ;;  %v245_v8 = vadd.f32 %v237_v44, %v231_v6 }
 0x194   :  { %395 = vrcp.f32 %v272_v4 }
 0x195   :  { %397 = vrcp.f32 %v271_v7  ;;  %v373_v11 = vmul.f32 -1.442695, %v245_v8  ;;  %v386_v12 = vpop.eup %385 }
 0x196   :  { %v273_v14 = vadd.f32 1.0, %v386_v12  ;;  %v388_v15 = vpop.eup %387 }
 0x197   :  { %399 = vpow2.f32 %v373_v11  ;;  %v276_v20 = vadd.f32 1.0, %v388_v15 }
 0x198   :  { %401 = vrcp.f32 %v273_v14 }
 0x199   :  { %v390_v16 = vpop.eup %389 }
 0x19a   :  { %v274_v17 = vadd.f32 1.0, %v390_v16  ;;  %v392_v18 = vpop.eup %391 }
 0x19b   :  { %v278_v26 = vadd.f32 1.0, %v392_v18 }
 0x19c   :  { %403 = vrcp.f32 %v274_v17 }
 0x19d   :  { %v394_v19 = vpop.eup %393 }
 0x19e   :  { %v396_v22 = vpop.eup %395  ;;  %v275_v23 = vadd.f32 1.0, %v394_v19 }
 0x19f   :  { %v398_v24 = vpop.eup %397  ;;  %302 = vperm.xlu0 %379, %v396_v22  }
 0x1a0   :  { %405 = vrcp.f32 %v275_v23  ;;  %297 = vperm.xlu1 %380, %v398_v24  }
 0x1a1   :  { %v400_v25 = vpop.eup %399  ;;  %407 = vrcp.f32 %v276_v20 }
 0x1a2   :  { %v277_v27 = vadd.f32 1.0, %v400_v25  ;;  %v402_v28 = vpop.eup %401 }
 0x1a4   :  { %409 = vrcp.f32 %v277_v27  ;;  %307 = vperm.xlu1 %380, %v402_v28  }
 0x1a5   :  { %411 = vrcp.f32 %v278_v26 }
 0x1a6   :  { %v404_v29 = vpop.eup %403 }
 0x1a8   :  { %312 = vperm.xlu1 %380, %v404_v29  }
 0x1aa   :  { %v406_v30 = vpop.eup %405 }
 0x1ab   :  { %v408_v31 = vpop.eup %407  ;;  %317 = vperm.xlu0 %379, %v406_v30  }
 0x1ac   :  { %322 = vperm.xlu1 %380, %v408_v31  }
 0x1ae   :  { %v410_v32 = vpop.eup %409 }
 0x1af   :  { %v412_v33 = vpop.eup %411  ;;  %327 = vperm.xlu0 %379, %v410_v32  }
 0x1b0   :  { %332 = vperm.xlu1 %380, %v412_v33  }
 0x21e   :  { %v303_v34 = vpop.permute.xlu0 %302 }
 0x21f   :  { %v336_v35 = vmul.f32 %v303_v34, %v503_v5  ;;  %v298_v36 = vpop.permute.xlu1 %297 }
 0x220   :  { %v335_v37 = vmul.f32 %v298_v36, %v489_v1 }
 0x221   :  { %344 = vst.msk [vmem:[#allocation2 + $0x8] sm:$0xff] %vm35_vm0, %v336_v35 }
 0x222   :  { %343 = vst.msk [vmem:[#allocation2] sm:$0xff] %vm35_vm0, %v335_v37 }
 0x223   :  { %v308_v38 = vpop.permute.xlu1 %307 }
 0x224   :  { %v337_v39 = vmul.f32 %v308_v38, %v517_v10 }
 0x226   :  { %345 = vst.msk [vmem:[#allocation2 + $0x10] sm:$0xff] %vm35_vm0, %v337_v39 }
 0x227   :  { %v313_v40 = vpop.permute.xlu1 %312 }
 0x228   :  { %v338_v41 = vmul.f32 %v313_v40, %v526_v13 }
 0x22a   :  { %346 = vst.msk [vmem:[#allocation2 + $0x18] sm:$0xff] %vm35_vm0, %v338_v41  ;;  %v318_v42 = vpop.permute.xlu0 %317 }
 0x22b   :  { %v339_v5 = vmul.f32 %v318_v42, %v484_v0  ;;  %v323_v43 = vpop.permute.xlu1 %322 }
 0x22c   :  { %v340_v1 = vmul.f32 %v323_v43, %v494_v2 }
 0x22d   :  { %347 = vst.msk [vmem:[#allocation2 + $0x20] sm:$0xff] %vm35_vm0, %v339_v5 }
 0x22e   :  { %348 = vst.msk [vmem:[#allocation2 + $0x28] sm:$0xff] %vm35_vm0, %v340_v1  ;;  %v328_v10 = vpop.permute.xlu0 %327 }
 0x22f   :  { %v341_v44 = vmul.f32 %v328_v10, %v512_v9  ;;  %v333_v45 = vpop.permute.xlu1 %332 }
 0x230   :  { %v342_v13 = vmul.f32 %v333_v45, %v551_v21 }
 0x231   :  { %349 = vst.msk [vmem:[#allocation2 + $0x30] sm:$0xff] %vm35_vm0, %v341_v44 }
 0x232   :  { %350 = vst.msk [vmem:[#allocation2 + $0x38] sm:$0xff] %vm35_vm0, %v342_v13 }
 0x233   :  { %424 = shalt.err (!%p421_p4)
}
 0x234   :  { %s425_s20 = scalar_lea.hbm %s675_s7, 1024 }
 0x235   :  { %p426_p5 = scmp.ne.s32.totalorder %s675_s7, %s425_s20  ;;  %p429_p6 = scmp.lt.u32.totalorder %s425_s20, %s675_s7 }
 0x237   :  { %p431_p7 = pnand %p429_p6, %p426_p5 }
 0x239   :  { %434 = shalt.err (!%p431_p7)
}
 0x23a   :  { %s439_s25 = smov 128   ;;  %s440_s26 = smov 8  }
 0x23b   :  { %362 = dma.vmem_to_hbm [thread:$0]  %s357_s17, 1024, %s675_s7, [#allocation3], %s439_s25, %s439_s25, %s440_s26  }
 0x23c   :  { %435 = dma.done.wait [#allocation3], 1024  }
 0x23d   :  { %436 = vsyncadd [#allocation3], 4294966272 }
 0x23e   :  { %366 = vsyncpa [#allocation3], 1 }

</bundles_post_ra>
